<compile_context>
chip_gen: v5e
topology: v5e:2x2
jax: 0.10.0
libtpu: 0.0.40
codegen_flags: <defaults>
</compile_context>

<pallas_src>
import functools

import jax
import jax.numpy as jnp
from jax.experimental import pallas as pl
from jax.experimental.pallas import tpu as pltpu


def _round_up(x, m):
    return (x + m - 1) // m * m


def gem_kernel(p_ref, x_ref, o_ref, acc_ref, *, eps, inv_hw, n_pad_cols):
    """One (batch, channel-tile, spatial-chunk) step of GeM pooling.

    p_ref   : SMEM (1,) f32                 learned exponent
    x_ref   : VMEM (1, CH_TILE, HW_TILE)    NCHW block (ch on sublanes, hw on lanes)
    o_ref   : VMEM (1, CH_TILE, 1)          pooled output (written at last k)
    acc_ref : VMEM (CH_TILE, 1) f32         running spatial sum of x**p
    """
    k = pl.program_id(2)

    @pl.when(k == 0)
    def _():
        acc_ref[...] = jnp.zeros_like(acc_ref)

    p = p_ref[0]
    x = x_ref[0].astype(jnp.float32)              # (CH_TILE, HW_TILE)
    xc = jnp.maximum(x, eps)                      # clamp(min=eps)
    xp = jnp.exp(p * jnp.log(xc))                 # x**p via log/exp (EUP slot)

    # Lane-direction reduce: VPU vreg adds across the hw/128 groups plus one
    # cross-lane (XLU) tail.  In the common full-hw-block case the spatial
    # grid axis has a single step, so this runs exactly once per output.
    acc_ref[...] += jnp.sum(xp, axis=-1, keepdims=True)

    @pl.when(k == pl.num_programs(2) - 1)
    def _():
        s = acc_ref[...]
        if n_pad_cols:
            # Zero-padded spatial columns (huge-feature-map fallback only)
            # clamp to eps and contribute exactly eps**p each; remove them
            # once here instead of masking every step.
            s = s - jnp.float32(n_pad_cols) * jnp.exp(p * jnp.log(jnp.float32(eps)))
        mean = s * inv_hw                         # fold mean's divide into finalize
        o_ref[0] = jnp.exp((1.0 / p) * jnp.log(mean)).astype(o_ref.dtype)


def gem_forward(x, p, eps=1e-6, block_bytes=8 * 1024 * 1024):
    """GeM pooling. x: (bs, ch, h, w), p: (1,) f32 -> (bs, ch)."""
    bs, ch, h, w = x.shape
    hw = h * w
    itemsize = jnp.dtype(x.dtype).itemsize

    # Free reshape; keeps the NCHW memory layout (no HBM transpose/pad pass).
    x3 = x.reshape(bs, ch, hw)

    # --- channel (sublane) tile: always an exact divisor of ch -------------
    ch_tile = ch
    if bs == 1 and ch >= 16 and ch % 16 == 0:
        ch_tile = ch // 2          # give v7x's two TensorCores >= 2 parallel units
    # Defensive: keep (ch_tile x 128 lanes) under the per-step block budget.
    while ch_tile * 128 * itemsize > block_bytes and ch_tile % 16 == 0:
        ch_tile //= 2
    n_ch = ch // ch_tile

    # --- spatial (lane) tile ------------------------------------------------
    max_hw_tile = max(128, (block_bytes // (ch_tile * itemsize)) // 128 * 128)
    if hw <= max_hw_tile:
        hw_tile, hw_pad = hw, hw            # full extent: contiguous DMA, no padding
    else:
        hw_tile = max_hw_tile               # huge-feature-map fallback (rare)
        hw_pad = _round_up(hw, hw_tile)
        x3 = jnp.pad(x3, ((0, 0), (0, 0), (0, hw_pad - hw)))
    n_hw = hw_pad // hw_tile
    n_pad_cols = hw_pad - hw

    grid = (bs, n_ch, n_hw)

    kernel = functools.partial(
        gem_kernel,
        eps=float(eps),
        inv_hw=1.0 / float(hw),
        n_pad_cols=int(n_pad_cols),
    )

    cost = pl.CostEstimate(
        flops=int(4 * bs * ch * hw_pad),
        transcendentals=int(2 * bs * ch * hw_pad + 2 * bs * ch),
        bytes_accessed=int(bs * ch * hw_pad * itemsize + bs * ch * 4),
    )

    out = pl.pallas_call(
        kernel,
        out_shape=jax.ShapeDtypeStruct((bs, ch, 1), x.dtype),
        grid_spec=pltpu.PrefetchScalarGridSpec(
            num_scalar_prefetch=0,
            grid=grid,
            in_specs=[
                pl.BlockSpec(memory_space=pltpu.SMEM),               # p scalar
                pl.BlockSpec((1, ch_tile, hw_tile),
                             lambda b, c, k: (b, c, k)),             # x block (NCHW)
            ],
            out_specs=pl.BlockSpec((1, ch_tile, 1),
                                   lambda b, c, k: (b, c, 0)),
            scratch_shapes=[pltpu.VMEM((ch_tile, 1), jnp.float32)],
        ),
        compiler_params=pltpu.CompilerParams(
            dimension_semantics=("parallel", "parallel", "arbitrary"),
            vmem_limit_bytes=48 * 1024 * 1024,
        ),
        cost_estimate=cost,
    )(p.astype(jnp.float32), x3)

    return out.reshape(bs, ch)


if __name__ == "__main__":
    key = jax.random.PRNGKey(0)
    bs, ch, h, w = 2, 4, 16, 16
    x = jax.random.normal(key, (bs, ch, h, w), dtype=jnp.float32)

    # Deterministic parameter init, matching nn.Parameter(torch.ones(1) * 3)
    p = jnp.ones((1,), dtype=jnp.float32) * 3.0
    eps = 1e-6

    out = jax.block_until_ready(gem_forward(x, p, eps))

    # Pure-JAX reference check (same math as the PyTorch forward)
    ref = jnp.power(
        jnp.mean(jnp.power(jnp.maximum(x, eps), p[0]), axis=(2, 3)),
        1.0 / p[0],
    )
    assert out.shape == (bs, ch)
    assert jnp.allclose(out, ref, rtol=1e-4, atol=1e-5), (out, ref)

    print("KERNEL_OK")
</pallas_src>

<mosaic_0001>
module attributes {stable_mosaic.version = 11 : i64} {
  func.func @gem_kernel(%arg0: i32, %arg1: i32, %arg2: i32, %arg3: memref<1xf32, #tpu.memory_space<smem>>, %arg4: memref<1x4x256xf32, #tpu.memory_space<vmem>>, %arg5: memref<1x4x1xf32, #tpu.memory_space<vmem>>, %arg6: memref<4x1xf32, #tpu.memory_space<vmem>>) attributes {dimension_semantics = [#tpu.dimension_semantics<parallel>, #tpu.dimension_semantics<parallel>, #tpu.dimension_semantics<arbitrary>], iteration_bounds = array<i64: 2, 1, 1>, scalar_prefetch = 0 : i64, scratch_operands = 1 : i64, tpu.core_type = #tpu.core_type<tc>, window_params = [{transform_indices = @transform_0, window_bounds = array<i64: 1>}, {transform_indices = @transform_1, window_bounds = array<i64: 1, 4, 256>}, {transform_indices = @transform_2, window_bounds = array<i64: 1, 4, 1>}]} {
    %c0_i32 = arith.constant 0 : i32
    %0 = arith.cmpi eq, %arg2, %c0_i32 : i32
    %1 = arith.extui %0 : i1 to i32
    %c0_i32_0 = arith.constant 0 : i32
    %2 = arith.cmpi ne, %1, %c0_i32_0 : i32
    scf.if %2 {
      %cst_11 = arith.constant 0.000000e+00 : f32
      %20 = vector.broadcast %cst_11 : f32 to vector<4x1xf32>
      %c0_12 = arith.constant 0 : index
      %c0_13 = arith.constant 0 : index
      %21 = vector.load %arg6[%c0_12, %c0_13] : memref<4x1xf32, #tpu.memory_space<vmem>>, vector<4x1xf32>
      tpu.vector_store %arg6[%c0_12, %c0_13], %20 {strides = array<i32>} : memref<4x1xf32, #tpu.memory_space<vmem>>, vector<4x1xf32>,
    } else {
    }
    %c0 = arith.constant 0 : index
    %3 = memref.load %arg3[%c0] : memref<1xf32, #tpu.memory_space<smem>>
    %c0_1 = arith.constant 0 : index
    %c0_2 = arith.constant 0 : index
    %c0_3 = arith.constant 0 : index
    %4 = vector.load %arg4[%c0_1, %c0_2, %c0_3] : memref<1x4x256xf32, #tpu.memory_space<vmem>>, vector<1x4x256xf32>
    %5 = vector.shape_cast %4 : vector<1x4x256xf32> to vector<4x256xf32>
    %cst = arith.constant 9.99999997E-7 : f32
    %6 = vector.broadcast %cst : f32 to vector<4x256xf32>
    %7 = arith.maximumf %5, %6 : vector<4x256xf32>
    %8 = math.log %7 : vector<4x256xf32>
    %9 = vector.broadcast %3 : f32 to vector<4x256xf32>
    %10 = arith.mulf %9, %8 : vector<4x256xf32>
    %11 = math.exp %10 : vector<4x256xf32>
    %c0_4 = arith.constant 0 : index
    %c0_5 = arith.constant 0 : index
    %12 = vector.load %arg6[%c0_4, %c0_5] : memref<4x1xf32, #tpu.memory_space<vmem>>, vector<4x1xf32>
    %cst_6 = arith.constant dense<0.000000e+00> : vector<4xf32>
    %13 = vector.multi_reduction <add>, %11, %cst_6 [1] : vector<4x256xf32> to vector<4xf32>
    %14 = vector.shape_cast %13 : vector<4xf32> to vector<4x1xf32>
    %15 = arith.addf %12, %14 : vector<4x1xf32>
    %c0_7 = arith.constant 0 : index
    %c0_8 = arith.constant 0 : index
    %16 = vector.load %arg6[%c0_7, %c0_8] : memref<4x1xf32, #tpu.memory_space<vmem>>, vector<4x1xf32>
    tpu.vector_store %arg6[%c0_7, %c0_8], %15 {strides = array<i32>} : memref<4x1xf32, #tpu.memory_space<vmem>>, vector<4x1xf32>,
    %c0_i32_9 = arith.constant 0 : i32
    %17 = arith.cmpi eq, %arg2, %c0_i32_9 : i32
    %18 = arith.extui %17 : i1 to i32
    %c0_i32_10 = arith.constant 0 : i32
    %19 = arith.cmpi ne, %18, %c0_i32_10 : i32
    scf.if %19 {
      %c0_11 = arith.constant 0 : index
      %c0_12 = arith.constant 0 : index
      %20 = vector.load %arg6[%c0_11, %c0_12] : memref<4x1xf32, #tpu.memory_space<vmem>>, vector<4x1xf32>
      %cst_13 = arith.constant 3.906250e-03 : f32
      %21 = vector.broadcast %cst_13 : f32 to vector<4x1xf32>
      %22 = arith.mulf %20, %21 : vector<4x1xf32>
      %cst_14 = arith.constant 1.000000e+00 : f32
      %23 = arith.divf %cst_14, %3 : f32
      %24 = math.log %22 : vector<4x1xf32>
      %25 = vector.broadcast %23 : f32 to vector<4x1xf32>
      %26 = arith.mulf %25, %24 : vector<4x1xf32>
      %27 = math.exp %26 : vector<4x1xf32>
      %c0_15 = arith.constant 0 : index
      %c0_16 = arith.constant 0 : index
      %c0_17 = arith.constant 0 : index
      %28 = vector.load %arg5[%c0_15, %c0_16, %c0_17] : memref<1x4x1xf32, #tpu.memory_space<vmem>>, vector<1x4x1xf32>
      %29 = vector.shape_cast %28 : vector<1x4x1xf32> to vector<4x1xf32>
      %30 = vector.shape_cast %27 : vector<4x1xf32> to vector<1x4x1xf32>
      tpu.vector_store %arg5[%c0_15, %c0_16, %c0_17], %30 {strides = array<i32>} : memref<1x4x1xf32, #tpu.memory_space<vmem>>, vector<1x4x1xf32>,
    } else {
    }
    return
  }
  func.func @transform_0(%arg0: i32, %arg1: i32, %arg2: i32) -> i32 {
    %c0_i32 = arith.constant 0 : i32
    %c0_i32_0 = arith.constant 0 : i32
    return %c0_i32 : i32
  }
  func.func @transform_1(%arg0: i32, %arg1: i32, %arg2: i32) -> (i32, i32, i32) {
    %c0_i32 = arith.constant 0 : i32
    return %arg0, %arg1, %arg2 : i32, i32, i32
  }
  func.func @transform_2(%arg0: i32, %arg1: i32, %arg2: i32) -> (i32, i32, i32) {
    %c0_i32 = arith.constant 0 : i32
    %c0_i32_0 = arith.constant 0 : i32
    return %arg0, %arg1, %c0_i32 : i32, i32, i32
  }
}

</mosaic_0001>

<bundles_post_ra>
// kernel: tpu_custom_call.1
= control target key start
LH: loop header
LB: loop body
LE: loop exit
PB: predicated region body
PF: predicated region fallthrough
CT: control target
= control target key end

     0   :  { %s622_s0 = inlined_call_operand.<no memory space> [shape: f32[1], index: 0, kind: input, shape index: {}]   ;;  %s623_s1 = inlined_call_operand.hbm [shape: f32[2,4,256], index: 1, kind: input, shape index: {}]   ;;  %s624_s2 = inlined_call_operand.vmem [shape: f32[2,4,1], index: 2, kind: output, shape index: {}]  }
   0x1   :  { %7 = sst [smem:[#allocation3]] %s622_s0 }
   0x2   :  { %8 = vsyncpa [#allocation5], 0 }
   0x3   :  { %10 = vsyncpa [#allocation5 + $0x1], 0  ;;  %s531_s11 = smov 0   ;;  %s533_s12 = smov 0  }
   0x4   :  { %s535_s13 = smov 0   ;;  %s537_s14 = smov 0  }
   0x5   :  { %s539_s15 = smov 0   ;;  %s541_s16 = smov 0  }
   0x6 LB: > { %s349_s0 = sadd.s32 4294967295, %s510_s16   ;;  %s35_s17 = sadd.s32 1, %s506_s15  ;;  %s510_s16 = sphi %s541_s16, %s16_s16   ;;  %s506_s15 = sphi %s539_s15, %s631_s15   ;;  %s502_s14 = sphi %s537_s14, %s630_s14   ;;  %s498_s13 = sphi %s535_s13, %s629_s13   ;;  %s494_s12 = sphi %s533_s12, %s628_s12   ;;  %s490_s11 = sphi %s531_s11, %s627_s11  }
   0x7   : > { %p37_p0 = scmp.ge.s32.totalorder %s35_s17, 2  ;;  %s67_s18 = sadd.s32 1, %s498_s13 }
   0x8   : > { %p74_p1 = scmp.ne.s32.totalorder %s498_s13, %s494_s12  ;;  %p75_p2 = scmp.eq.s32.totalorder %s510_s16, 0 }
   0x9   : > { %s633_s17 = smov (%p37_p0, %s35_s17), 0  ;;  %p80_p4 = scmp.ne.s32.totalorder %s494_s12, %s490_s11 }
   0xa   : > { %p567_p3 = por %p75_p2, %p74_p1  ;;  %s60_s20 = ssub.s32 %s506_s15, %s633_s17 }
   0xb   : > { %p81_p5 = scmp.eq.s32.totalorder %s349_s0, 0  ;;  %p65_p6 = scmp.eq.s32.totalorder %s60_s20, 0 }
   0xc   : > { %p370_p8 = scmp.lt.s32.totalorder %s510_s16, 2  ;;  %s135_s23 = sand.u32 1, %s498_s13  }
   0xd   : > { %p574_p7 = por %p81_p5, %p80_p4  ;;  %s361_s24 = sshll.u32 %s506_s15, 3 }
   0xe   : > { %s580_s22 = scalar_select %p65_p6, %s498_s13, %s67_s18  }
   0xf   : > { %s353_s25 = sshll.u32 %s135_s23, 3  ;;  %s148_s28 = scalar_lea.hbm %s623_s1, %s361_s24 }
  0x10   : > { %s150_s29 = sshll.u32 %s148_s28, 4  ;;  %s139_s30 = scalar_lea.vmem [#allocation4], %s353_s25  ;;  %s151_s29 = int_to_ptr.hbm [resolvable:$true] %s150_s29 }
  0x11   : > { %s152_s3 = sshll.u32 %s139_s30, 4  ;;  %p367_p9 = pnand %p370_p8, %p567_p3  ;;  %s153_s3 = int_to_ptr.vmem [resolvable:$true] %s152_s3 }
  0x12   : > { %p356_p10 = scmp.ge.s32.totalorder %s510_s16, 1  ;;  %p157_p11 = scmp.lt.s32.totalorder %s510_s16, 3 }
  0x13   : > { %s136_s4 = scalar_lea.sflag [#allocation5], %s135_s23 }
  0x14   : > { %369 = dma.hbm_to_vmem [thread:$0]  (!%p367_p9), %s151_s29, 128, %s153_s3, %s136_s4  }
  0x15   : > { %p158_p12 = pnand %p356_p10, %p157_p11 }
  0x16   : > { %s163_s5 = sand.u32 (!%p158_p12), 1, %s494_s12  }
  0x17   : > { %161 = sbr.rel (%p158_p12) target bundleno = 217 (0xd9), region = 28  ;;  %s357_s6 = sshll.u32 (!%p158_p12), %s163_s5, 3 }
  0x18   : > { %s164_s7 = scalar_lea.sflag (!%p158_p12), [#allocation5], %s163_s5  ;;  %s167_s8 = scalar_lea.vmem (!%p158_p12), [#allocation4], %s357_s6 }
  0x1c   : > { %485 = dma.done.wait (%p574_p7), %s164_s7, 128  }
  0x1d   : > { %487 = vsyncadd (%p574_p7), %s164_s7, 4294967168  ;;  %s205_s9 = sld [smem:[#allocation3]]  ;;  %v206_v0 = vld [vmem:[%s167_s8] sm:$0xff]  ;;  %vm203_vm0 = vcmask 3072   ;;  %v512_v3 = vmov 0.0   ;;  %vm221_vm5 = vcmask 1043456  }
  0x1e   : > { %v207_v2 = vmax.f32 %v206_v0, 1e-06  ;;  %204 = vst.msk [vmem:[#allocation2] sm:$0xf] %vm203_vm0, %v512_v3  ;;  %p192_p13 = scmp.lt.s32.totalorder %s502_s14, 1 }
  0x20   : > { %s635_s14 = smov (!%p192_p13, %s502_s14), 1 }
  0x21   : > { %s358_s11 = sshll.u32 %s635_s14, 2 }
  0x22   : > { %s198_s19 = scalar_lea.vmem %s624_s2, %s358_s11 }
  0x23   : > { %v210_v1 = vstv %s205_s9 }
  0x24   : > { %420 = vrcp.f32 %v210_v1  ;;  %vm241_vm1 = vweird.f32 %v210_v1  ;;  %v247_v7 = vand.u32 2147483648, %v210_v1  ;;  %v245_v10 = vand.u32 2147483647, %v210_v1 }
  0x25   : > { %422 = vlog2.f32 %v207_v2  ;;  %v214_v24 = vld [vmem:[#allocation2] sm:$0xf] }
  0x26   : > { %v248_v13 = vor.u32 1.1754944e-38, %v247_v7  ;;  %vm246_vm4 = vcmp.eq.f32.partialorder %v245_v10, 8.507059e+37 }
  0x2a   : > { %v421_v4 = vpop.eup %420 }
  0x2b   : > { %v237_v5 = vmul.f32 %v421_v4, %v210_v1  ;;  %v423_v6 = vpop.eup %422  ;;  %vm242_vm2 = vweird.f32 %v421_v4 }
  0x2c   : > { %v209_v8 = vmul.f32 0.6931472, %v423_v6  ;;  %vm243_vm3 = vmor %vm241_vm1, %vm242_vm2 }
  0x2d   : > { %v238_v9 = vsub.f32 1.0, %v237_v5 }
  0x2e   : > { %v211_v11 = vmul.f32 %v210_v1, %v209_v8 }
  0x2f   : > { %v239_v12 = vmul.f32 %v421_v4, %v238_v9 }
  0x30   : > { %v212_v14 = vmul.f32 1.442695, %v211_v11 }
  0x31   : > { %v240_v15 = vadd.f32 %v421_v4, %v239_v12 }
  0x32   : > { %424 = vpow2.f32 %v212_v14 }
  0x33   : > { %v244_v16 = vsel %vm243_vm3, %v421_v4, %v240_v15 }
  0x34   : > { %v249_v17 = vsel %vm246_vm4, %v248_v13, %v244_v16 }
  0x35   : > { %362 = vpush %v249_v17 }
  0x38   : > { %v425_v18 = vpop.eup %424 }
  0x39   : > { %216 = vst [vmem:[#allocation1] ss:$2 sm:$0xff] %v425_v18 }
  0x40   : > { %v217_v19 = vld.sshfl [vmem:[#allocation1] sm:$0xff pattern:$0x75316420]  ;;  %v218_v20 = vld.sshfl [vmem:[#allocation1 + $0x8] sm:$0xff pattern:$0x75316420] }
  0x41   : > { %v222_v21 = vsel %vm221_vm5, %v217_v19, 0.0  ;;  %v223_v22 = vsel %vm221_vm5, %v218_v20, 0.0 }
  0x42   : > { %v224_v23 = vadd.f32 %v223_v22, %v222_v21 }
  0x44   : > { %225 = vadd.xlane.f32.xlu0 %v224_v23 }
  0x66   : > { %s363_s10 = spop %362 }
  0x67   : > { %v253_v30 = vstv %s363_s10 }
  0xb7   : > { %v226_v25 = vpop.xlane.xlu0 %225 }
  0xb8   : > { %v227_v26 = vadd.f32 %v226_v25, %v214_v24 }
  0xba   : > { %229 = vst.msk [vmem:[#allocation2] sm:$0xf] %vm203_vm0, %v227_v26 }
  0xc1   : > { %v233_v27 = vld [vmem:[#allocation2] sm:$0xf] }
  0xc2   : > { %v234_v28 = vmul.f32 0.00390625, %v233_v27 }
  0xc4   : > { %426 = vlog2.f32 %v234_v28 }
  0xca   : > { %v427_v29 = vpop.eup %426 }
  0xcb   : > { %v252_v31 = vmul.f32 0.6931472, %v427_v29 }
  0xcd   : > { %v254_v32 = vmul.f32 %v253_v30, %v252_v31 }
  0xcf   : > { %v255_v33 = vmul.f32 1.442695, %v254_v32 }
  0xd1   : > { %428 = vpow2.f32 %v255_v33 }
  0xd7   : > { %v429_v34 = vpop.eup %428 }
  0xd8   : > { %257 = vst.msk [vmem:[%s198_s19] sm:$0xf] %vm203_vm0, %v429_v34 }
  0xd9 PF: > { %s16_s16 = sadd.s32 1, %s510_s16   ;;  %s627_s11 = smov %s494_s12 }
  0xda   : > { %p13_p0 = scmp.ge.s32.totalorder %s16_s16, 4   ;;  %s628_s12 = smov %s498_s13 }
  0xdb   : > { %s629_s13 = smov %s580_s22  ;;  %s630_s14 = smov %s506_s15 }
  0xdc   : > { %s631_s15 = smov %s633_s17  ;;  %15 = sbr.rel (!%p13_p0) target bundleno = 6 (0x6), region = 76 }
  0xe1   :  { %283 = vsyncpa [#allocation5], 1 }
  0xe2   :  { %285 = vsyncpa [#allocation5 + $0x1], 1 }

</bundles_post_ra>
